<compile_context>
chip_gen: v7x
topology: tpu7x:2x2x1
jax: 0.10.0
libtpu: 0.0.40
codegen_flags: <defaults>
</compile_context>

<pallas_src>
import functools
import itertools

import numpy as np
import jax
import jax.numpy as jnp
from jax.experimental import pallas as pl
from jax.experimental.pallas import tpu as pltpu


def _cost_kernel(logits_ref, pfeat_ref, onehot_ref, tfeat_ref, out_ref,
                 *, w_bbox, w_giou):
    # ---- unnormalized softmax + class gather via one-hot matmul ---------------
    logits = logits_ref[...]                                   # [tile_n, ncls]
    m = jnp.max(logits, axis=-1, keepdims=True)
    e = jnp.exp(logits - m)                                    # [tile_n, ncls]
    denom = jnp.sum(e, axis=-1, keepdims=True)                 # [tile_n, 1]

    # onehot_ref is pre-scaled by -w_class, so this IS the weighted class cost
    # once normalized by 1/denom.
    cls_unnorm = jnp.dot(e, onehot_ref[...],
                         preferred_element_type=jnp.float32)   # [tile_n, T]
    cost_class = cls_unnorm * pl.reciprocal(denom, approx=True)

    # ---- prediction features (hoisted in wrapper):
    #      cols: 0:cx 1:cy 2:w 3:h 4:x0 5:y0 6:x1 7:y1 8:area --------------------
    pcx, pcy = pfeat_ref[:, 0:1], pfeat_ref[:, 1:2]            # [tile_n, 1]
    pw, ph = pfeat_ref[:, 2:3], pfeat_ref[:, 3:4]
    px0, py0 = pfeat_ref[:, 4:5], pfeat_ref[:, 5:6]
    px1, py1 = pfeat_ref[:, 6:7], pfeat_ref[:, 7:8]
    area_p = pfeat_ref[:, 8:9]

    # ---- target features (hoisted in wrapper), rows:
    #      0:cx 1:cy 2:w 3:h 4:x0 5:y0 6:x1 7:y1 ---------------------------------
    tcx, tcy = tfeat_ref[0:1, :], tfeat_ref[1:2, :]            # [1, T]
    tw, th = tfeat_ref[2:3, :], tfeat_ref[3:4, :]
    tx0, ty0 = tfeat_ref[4:5, :], tfeat_ref[5:6, :]
    tx1, ty1 = tfeat_ref[6:7, :], tfeat_ref[7:8, :]
    area_t = tw * th                                           # [1, T]

    # ---- cost_bbox = L1 cdist on (cx, cy, w, h) -------------------------------
    l1 = (jnp.abs(pcx - tcx) + jnp.abs(pcy - tcy)
          + jnp.abs(pw - tw) + jnp.abs(ph - th))               # [tile_n, T]

    # ---- cost_giou = -w_giou * generalized_box_iou ----------------------------
    iw_raw = jnp.minimum(px1, tx1) - jnp.maximum(px0, tx0)     # [tile_n, T]
    ih_raw = jnp.minimum(py1, ty1) - jnp.maximum(py0, ty0)
    inter = jnp.maximum(iw_raw, 0.0) * jnp.maximum(ih_raw, 0.0)
    union = area_p + area_t - inter
    iou = inter * pl.reciprocal(union, approx=True)

    # enclosing box via identity: max(a1,b1)-min(a0,b0) = (a1-a0)+(b1-b0)-iw_raw
    ew = (pw + tw) - iw_raw
    eh = (ph + th) - ih_raw
    earea = ew * eh
    # w_giou * ((earea - union)/earea - iou) == -w_giou * giou
    giou_cost = w_giou * ((earea - union) * pl.reciprocal(earea, approx=True) - iou)

    out_ref[...] = (w_bbox * l1 + cost_class + giou_cost).astype(out_ref.dtype)


def _round_up(x, m):
    return ((x + m - 1) // m) * m


def _choose_tiling(n, ncls, t_pad, target_tile=2048, vmem_budget_bytes=24 << 20):
    """Pick (tile_n, n_pad): large tiles to amortize per-grid-step overhead, capped so
    the double-buffered working set fits the scoped-VMEM budget, with an even grid
    length when split (v7x 2-TensorCore balance)."""
    n8 = _round_up(max(n, 8), 8)
    resident = 4 * (ncls + 8) * t_pad                 # one-hot + tfeat blocks
    per_row = 4 * (ncls + 9 + t_pad)                  # logits + pfeat + out, per N row
    cap_rows = (vmem_budget_bytes - 2 * resident) // (2 * per_row)
    cap_rows = max(8, (cap_rows // 8) * 8)
    tile_n = min(target_tile, n8, cap_rows)
    if tile_n >= n8:
        return n8, n8                                  # single tile covers everything
    num_tiles = -(-n8 // tile_n)
    if num_tiles % 2:
        num_tiles += 1                                 # even grid -> balanced 2-TC split
    tile_n = _round_up(-(-n8 // num_tiles), 8)
    return tile_n, tile_n * num_tiles


def _compute_cost_matrix(pred_logits, pred_boxes, tgt_ids, tgt_bbox,
                         cost_class, cost_bbox, cost_giou):
    bs, nq, ncls = pred_logits.shape
    n = bs * nq
    t = int(tgt_ids.shape[0])

    # ---- pad T (lane axis) to a multiple of 128 for lane-dense stores ---------
    t_pad = max(128, _round_up(t, 128))

    # ---- tile / pad N ----------------------------------------------------------
    tile_n, n_pad = _choose_tiling(n, ncls, t_pad)

    logits_flat = pred_logits.reshape(n, ncls).astype(jnp.float32)
    boxes_flat = pred_boxes.reshape(n, 4).astype(jnp.float32)
    if n_pad > n:
        logits_flat = jnp.pad(logits_flat, ((0, n_pad - n), (0, 0)))
        pad_boxes = jnp.tile(jnp.array([[0.5, 0.5, 1.0, 1.0]], jnp.float32),
                             (n_pad - n, 1))
        boxes_flat = jnp.concatenate([boxes_flat, pad_boxes], axis=0)

    # ---- prediction-side hoist: cxcywh -> xyxy + area, lane-dense in XLA -------
    pcx, pcy = boxes_flat[:, 0:1], boxes_flat[:, 1:2]
    pw, ph = boxes_flat[:, 2:3], boxes_flat[:, 3:4]
    px0, px1 = pcx - 0.5 * pw, pcx + 0.5 * pw
    py0, py1 = pcy - 0.5 * ph, pcy + 0.5 * ph
    area_p = (px1 - px0) * (py1 - py0)
    pfeat = jnp.concatenate(
        [pcx, pcy, pw, ph, px0, py0, px1, py1, area_p], axis=1)  # [n_pad, 9]

    # ---- target-side hoist ------------------------------------------------------
    tgt_ids = tgt_ids.astype(jnp.int32)
    tgt_bbox = tgt_bbox.astype(jnp.float32)
    if t_pad > t:
        # dummy targets: class id = ncls (never matched by one-hot), valid unit box
        tgt_ids_p = jnp.concatenate(
            [tgt_ids, jnp.full((t_pad - t,), ncls, jnp.int32)])
        pad_tb = jnp.tile(jnp.array([[0.5, 0.5, 1.0, 1.0]], jnp.float32),
                          (t_pad - t, 1))
        tgt_bbox_p = jnp.concatenate([tgt_bbox, pad_tb], axis=0)
    else:
        tgt_ids_p, tgt_bbox_p = tgt_ids, tgt_bbox

    # one-hot pre-scaled by -w_class: column j has -w_class at row tgt_ids[j]
    cls_iota = jnp.arange(ncls, dtype=jnp.int32)[:, None]                # [ncls,1]
    onehot = jnp.where(cls_iota == tgt_ids_p[None, :],
                       jnp.float32(-cost_class), jnp.float32(0.0))       # [ncls,T]

    tcx, tcy = tgt_bbox_p[:, 0], tgt_bbox_p[:, 1]
    tw, th = tgt_bbox_p[:, 2], tgt_bbox_p[:, 3]
    tx0, tx1 = tcx - 0.5 * tw, tcx + 0.5 * tw
    ty0, ty1 = tcy - 0.5 * th, tcy + 0.5 * th
    # exactly 8 rows -> a single (8,128) sublane tile; area_t recomputed in-kernel
    tfeat = jnp.stack([tcx, tcy, tw, th, tx0, ty0, tx1, ty1], axis=0)    # [8,T]

    kernel = functools.partial(_cost_kernel, w_bbox=cost_bbox, w_giou=cost_giou)
    grid = (n_pad // tile_n,)

    c = pl.pallas_call(
        kernel,
        out_shape=jax.ShapeDtypeStruct((n_pad, t_pad), jnp.float32),
        grid=grid,
        in_specs=[
            pl.BlockSpec((tile_n, ncls), lambda i: (i, 0)),   # logits: tiled over N
            pl.BlockSpec((tile_n, 9), lambda i: (i, 0)),      # pred features: tiled
            pl.BlockSpec((ncls, t_pad), lambda i: (0, 0)),    # scaled one-hot: resident
            pl.BlockSpec((8, t_pad), lambda i: (0, 0)),       # target features: resident
        ],
        out_specs=pl.BlockSpec((tile_n, t_pad), lambda i: (i, 0)),
        compiler_params=pltpu.CompilerParams(
            dimension_semantics=("parallel",),
            vmem_limit_bytes=32 << 20),                       # explicit guard (<= physical on all gens)
    )(logits_flat, pfeat, onehot, tfeat)

    return c[:n, :t]


def _brute_force_lsa(cost):
    """Exact linear sum assignment for small matrices (rows >= cols)."""
    nq, nt = cost.shape
    best, best_perm = None, None
    for perm in itertools.permutations(range(nq), nt):
        s = sum(cost[perm[j], j] for j in range(nt))
        if best is None or s < best:
            best, best_perm = s, perm
    pairs = sorted(zip(best_perm, range(nt)))
    rows = np.asarray([p[0] for p in pairs], dtype=np.int64)
    cols = np.asarray([p[1] for p in pairs], dtype=np.int64)
    return rows, cols


def hungarian_matcher(pred_logits, pred_boxes, tgt_ids, tgt_bbox, sizes,
                      cost_class=1.0, cost_bbox=1.0, cost_giou=1.0):
    bs, nq, _ = pred_logits.shape
    c_flat = _compute_cost_matrix(pred_logits, pred_boxes, tgt_ids, tgt_bbox,
                                  cost_class, cost_bbox, cost_giou)
    c_flat = jax.block_until_ready(c_flat)
    c = np.asarray(c_flat).reshape(bs, nq, -1)

    indices = []
    off = 0
    for b, s in enumerate(sizes):
        sub = c[b, :, off:off + s]        # padding already sliced off on device
        indices.append(_brute_force_lsa(sub))
        off += s
    return indices


def _reference_cost_matrix(pred_logits, pred_boxes, tgt_ids, tgt_bbox,
                           cost_class, cost_bbox, cost_giou):
    """Pure-JAX reference of the DETR matching cost for validation."""
    bs, nq, ncls = pred_logits.shape
    out_prob = jax.nn.softmax(pred_logits.reshape(bs * nq, ncls), axis=-1)
    out_bbox = pred_boxes.reshape(bs * nq, 4)
    cclass = -out_prob[:, tgt_ids]
    cbbox = jnp.sum(jnp.abs(out_bbox[:, None, :] - tgt_bbox[None, :, :]), axis=-1)

    def to_xyxy(b):
        cx, cy, w, h = b[..., 0], b[..., 1], b[..., 2], b[..., 3]
        return jnp.stack([cx - 0.5 * w, cy - 0.5 * h, cx + 0.5 * w, cy + 0.5 * h], -1)

    b1, b2 = to_xyxy(out_bbox), to_xyxy(tgt_bbox)
    a1 = (b1[:, 2] - b1[:, 0]) * (b1[:, 3] - b1[:, 1])
    a2 = (b2[:, 2] - b2[:, 0]) * (b2[:, 3] - b2[:, 1])
    lt = jnp.maximum(b1[:, None, :2], b2[None, :, :2])
    rb = jnp.minimum(b1[:, None, 2:], b2[None, :, 2:])
    wh = jnp.clip(rb - lt, 0.0)
    inter = wh[..., 0] * wh[..., 1]
    union = a1[:, None] + a2[None, :] - inter
    iou = inter / union
    lte = jnp.minimum(b1[:, None, :2], b2[None, :, :2])
    rbe = jnp.maximum(b1[:, None, 2:], b2[None, :, 2:])
    whe = jnp.clip(rbe - lte, 0.0)
    earea = whe[..., 0] * whe[..., 1]
    giou = iou - (earea - union) / earea
    return cost_bbox * cbbox + cost_class * cclass + cost_giou * (-giou)


if __name__ == "__main__":
    key = jax.random.PRNGKey(0)
    bs, nq, ncls = 2, 8, 32
    sizes = [3, 2]                      # targets per image
    T = sum(sizes)

    k1, k2, k3, k4, k5 = jax.random.split(key, 5)
    pred_logits = jax.random.normal(k1, (bs, nq, ncls), dtype=jnp.float32)
    pred_boxes = jax.nn.sigmoid(jax.random.normal(k2, (bs, nq, 4), dtype=jnp.float32))
    tgt_ids = jax.random.randint(k3, (T,), 0, ncls, dtype=jnp.int32)
    tgt_cxcy = jax.random.uniform(k4, (T, 2), minval=0.2, maxval=0.8)
    tgt_wh = jax.random.uniform(k5, (T, 2), minval=0.05, maxval=0.3)
    tgt_bbox = jnp.concatenate([tgt_cxcy, tgt_wh], axis=-1).astype(jnp.float32)

    # matcher "parameters" (deterministic, DETR defaults)
    w_class, w_bbox, w_giou = 1.0, 5.0, 2.0

    # Kernel cost matrix vs pure-JAX reference.  Tolerance relaxed vs the exact
    # version because the hot-path divides use the EUP approx reciprocal.
    c_kernel = np.asarray(jax.block_until_ready(
        _compute_cost_matrix(pred_logits, pred_boxes, tgt_ids, tgt_bbox,
                             w_class, w_bbox, w_giou)))
    c_ref = np.asarray(_reference_cost_matrix(pred_logits, pred_boxes, tgt_ids,
                                              tgt_bbox, w_class, w_bbox, w_giou))
    np.testing.assert_allclose(c_kernel, c_ref, rtol=1e-2, atol=1e-2)

    # Full matcher forward (kernel cost matrix + host assignment)
    indices = hungarian_matcher(pred_logits, pred_boxes, tgt_ids, tgt_bbox, sizes,
                                cost_class=w_class, cost_bbox=w_bbox, cost_giou=w_giou)
    assert len(indices) == bs
    for (i_idx, j_idx), s in zip(indices, sizes):
        assert i_idx.shape == (s,) and j_idx.shape == (s,)
        assert i_idx.dtype == np.int64 and j_idx.dtype == np.int64

    print("KERNEL_OK")
</pallas_src>

<mosaic_0001>
module attributes {stable_mosaic.version = 11 : i64} {
  func.func @_cost_kernel(%arg0: i32, %arg1: memref<16x32xf32, #tpu.memory_space<vmem>>, %arg2: memref<16x9xf32, #tpu.memory_space<vmem>>, %arg3: memref<32x128xf32, #tpu.memory_space<vmem>>, %arg4: memref<8x128xf32, #tpu.memory_space<vmem>>, %arg5: memref<16x128xf32, #tpu.memory_space<vmem>>) attributes {dimension_semantics = [#tpu.dimension_semantics<parallel>], iteration_bounds = array<i64: 1>, scalar_prefetch = 0 : i64, scratch_operands = 0 : i64, tpu.core_type = #tpu.core_type<tc>, window_params = [{transform_indices = @transform_0, window_bounds = array<i64: 16, 32>}, {transform_indices = @transform_1, window_bounds = array<i64: 16, 9>}, {pipeline_mode = #tpu.pipeline_mode<synchronous>, transform_indices = @transform_2, window_bounds = array<i64: 32, 128>}, {pipeline_mode = #tpu.pipeline_mode<synchronous>, transform_indices = @transform_3, window_bounds = array<i64: 8, 128>}, {transform_indices = @transform_4, window_bounds = array<i64: 16, 128>}]} {
    %c0 = arith.constant 0 : index
    %c0_0 = arith.constant 0 : index
    %0 = vector.load %arg1[%c0, %c0_0] : memref<16x32xf32, #tpu.memory_space<vmem>>, vector<16x32xf32>
    %cst = arith.constant dense<0xFF800000> : vector<16xf32>
    %1 = vector.multi_reduction <maximumf>, %0, %cst [1] : vector<16x32xf32> to vector<16xf32>
    %2 = vector.shape_cast %1 : vector<16xf32> to vector<16x1xf32>
    %3 = vector.broadcast %2 : vector<16x1xf32> to vector<16x32xf32>
    %4 = arith.subf %0, %3 : vector<16x32xf32>
    %5 = math.exp %4 : vector<16x32xf32>
    %cst_1 = arith.constant dense<0.000000e+00> : vector<16xf32>
    %6 = vector.multi_reduction <add>, %5, %cst_1 [1] : vector<16x32xf32> to vector<16xf32>
    %7 = vector.shape_cast %6 : vector<16xf32> to vector<16x1xf32>
    %c0_2 = arith.constant 0 : index
    %c0_3 = arith.constant 0 : index
    %8 = vector.load %arg3[%c0_2, %c0_3] : memref<32x128xf32, #tpu.memory_space<vmem>>, vector<32x128xf32>
    %cst_4 = arith.constant dense<0.000000e+00> : vector<16x128xf32>
    %9 = tpu.matmul %5, %8, %cst_4 {dimension_numbers = #tpu.dot_dimension_numbers<[1], [0], [0], [1], [0, 0, 1, 1], [], []>} : vector<16x32xf32>, vector<32x128xf32>, vector<16x128xf32> -> vector<16x128xf32>
    %10 = tpu.reciprocal %7 {approx = true} : vector<16x1xf32> -> vector<16x1xf32>
    %11 = vector.broadcast %10 : vector<16x1xf32> to vector<16x128xf32>
    %12 = arith.mulf %9, %11 : vector<16x128xf32>
    %c0_5 = arith.constant 0 : index
    %c0_6 = arith.constant 0 : index
    %13 = vector.load %arg2[%c0_5, %c0_6] : memref<16x9xf32, #tpu.memory_space<vmem>>, vector<16x1xf32>
    %c0_7 = arith.constant 0 : index
    %c1 = arith.constant 1 : index
    %14 = vector.load %arg2[%c0_7, %c1] : memref<16x9xf32, #tpu.memory_space<vmem>>, vector<16x1xf32>
    %c0_8 = arith.constant 0 : index
    %c2 = arith.constant 2 : index
    %15 = vector.load %arg2[%c0_8, %c2] : memref<16x9xf32, #tpu.memory_space<vmem>>, vector<16x1xf32>
    %c0_9 = arith.constant 0 : index
    %c3 = arith.constant 3 : index
    %16 = vector.load %arg2[%c0_9, %c3] : memref<16x9xf32, #tpu.memory_space<vmem>>, vector<16x1xf32>
    %c0_10 = arith.constant 0 : index
    %c4 = arith.constant 4 : index
    %17 = vector.load %arg2[%c0_10, %c4] : memref<16x9xf32, #tpu.memory_space<vmem>>, vector<16x1xf32>
    %c0_11 = arith.constant 0 : index
    %c5 = arith.constant 5 : index
    %18 = vector.load %arg2[%c0_11, %c5] : memref<16x9xf32, #tpu.memory_space<vmem>>, vector<16x1xf32>
    %c0_12 = arith.constant 0 : index
    %c6 = arith.constant 6 : index
    %19 = vector.load %arg2[%c0_12, %c6] : memref<16x9xf32, #tpu.memory_space<vmem>>, vector<16x1xf32>
    %c0_13 = arith.constant 0 : index
    %c7 = arith.constant 7 : index
    %20 = vector.load %arg2[%c0_13, %c7] : memref<16x9xf32, #tpu.memory_space<vmem>>, vector<16x1xf32>
    %c0_14 = arith.constant 0 : index
    %c8 = arith.constant 8 : index
    %21 = vector.load %arg2[%c0_14, %c8] : memref<16x9xf32, #tpu.memory_space<vmem>>, vector<16x1xf32>
    %c0_15 = arith.constant 0 : index
    %c0_16 = arith.constant 0 : index
    %22 = vector.load %arg4[%c0_15, %c0_16] : memref<8x128xf32, #tpu.memory_space<vmem>>, vector<1x128xf32>
    %c1_17 = arith.constant 1 : index
    %c0_18 = arith.constant 0 : index
    %23 = vector.load %arg4[%c1_17, %c0_18] : memref<8x128xf32, #tpu.memory_space<vmem>>, vector<1x128xf32>
    %c2_19 = arith.constant 2 : index
    %c0_20 = arith.constant 0 : index
    %24 = vector.load %arg4[%c2_19, %c0_20] : memref<8x128xf32, #tpu.memory_space<vmem>>, vector<1x128xf32>
    %c3_21 = arith.constant 3 : index
    %c0_22 = arith.constant 0 : index
    %25 = vector.load %arg4[%c3_21, %c0_22] : memref<8x128xf32, #tpu.memory_space<vmem>>, vector<1x128xf32>
    %c4_23 = arith.constant 4 : index
    %c0_24 = arith.constant 0 : index
    %26 = vector.load %arg4[%c4_23, %c0_24] : memref<8x128xf32, #tpu.memory_space<vmem>>, vector<1x128xf32>
    %c5_25 = arith.constant 5 : index
    %c0_26 = arith.constant 0 : index
    %27 = vector.load %arg4[%c5_25, %c0_26] : memref<8x128xf32, #tpu.memory_space<vmem>>, vector<1x128xf32>
    %c6_27 = arith.constant 6 : index
    %c0_28 = arith.constant 0 : index
    %28 = vector.load %arg4[%c6_27, %c0_28] : memref<8x128xf32, #tpu.memory_space<vmem>>, vector<1x128xf32>
    %c7_29 = arith.constant 7 : index
    %c0_30 = arith.constant 0 : index
    %29 = vector.load %arg4[%c7_29, %c0_30] : memref<8x128xf32, #tpu.memory_space<vmem>>, vector<1x128xf32>
    %30 = arith.mulf %24, %25 : vector<1x128xf32>
    %31 = vector.broadcast %13 : vector<16x1xf32> to vector<16x128xf32>
    %32 = vector.broadcast %22 : vector<1x128xf32> to vector<16x128xf32>
    %33 = arith.subf %31, %32 : vector<16x128xf32>
    %34 = math.absf %33 : vector<16x128xf32>
    %35 = vector.broadcast %14 : vector<16x1xf32> to vector<16x128xf32>
    %36 = vector.broadcast %23 : vector<1x128xf32> to vector<16x128xf32>
    %37 = arith.subf %35, %36 : vector<16x128xf32>
    %38 = math.absf %37 : vector<16x128xf32>
    %39 = arith.addf %34, %38 : vector<16x128xf32>
    %40 = vector.broadcast %15 : vector<16x1xf32> to vector<16x128xf32>
    %41 = vector.broadcast %24 : vector<1x128xf32> to vector<16x128xf32>
    %42 = arith.subf %40, %41 : vector<16x128xf32>
    %43 = math.absf %42 : vector<16x128xf32>
    %44 = arith.addf %39, %43 : vector<16x128xf32>
    %45 = vector.broadcast %16 : vector<16x1xf32> to vector<16x128xf32>
    %46 = vector.broadcast %25 : vector<1x128xf32> to vector<16x128xf32>
    %47 = arith.subf %45, %46 : vector<16x128xf32>
    %48 = math.absf %47 : vector<16x128xf32>
    %49 = arith.addf %44, %48 : vector<16x128xf32>
    %50 = vector.broadcast %19 : vector<16x1xf32> to vector<16x128xf32>
    %51 = vector.broadcast %28 : vector<1x128xf32> to vector<16x128xf32>
    %52 = arith.minimumf %50, %51 : vector<16x128xf32>
    %53 = vector.broadcast %17 : vector<16x1xf32> to vector<16x128xf32>
    %54 = vector.broadcast %26 : vector<1x128xf32> to vector<16x128xf32>
    %55 = arith.maximumf %53, %54 : vector<16x128xf32>
    %56 = arith.subf %52, %55 : vector<16x128xf32>
    %57 = vector.broadcast %20 : vector<16x1xf32> to vector<16x128xf32>
    %58 = vector.broadcast %29 : vector<1x128xf32> to vector<16x128xf32>
    %59 = arith.minimumf %57, %58 : vector<16x128xf32>
    %60 = vector.broadcast %18 : vector<16x1xf32> to vector<16x128xf32>
    %61 = vector.broadcast %27 : vector<1x128xf32> to vector<16x128xf32>
    %62 = arith.maximumf %60, %61 : vector<16x128xf32>
    %63 = arith.subf %59, %62 : vector<16x128xf32>
    %cst_31 = arith.constant 0.000000e+00 : f32
    %64 = vector.broadcast %cst_31 : f32 to vector<16x128xf32>
    %65 = arith.maximumf %56, %64 : vector<16x128xf32>
    %cst_32 = arith.constant 0.000000e+00 : f32
    %66 = vector.broadcast %cst_32 : f32 to vector<16x128xf32>
    %67 = arith.maximumf %63, %66 : vector<16x128xf32>
    %68 = arith.mulf %65, %67 : vector<16x128xf32>
    %69 = vector.broadcast %21 : vector<16x1xf32> to vector<16x128xf32>
    %70 = vector.broadcast %30 : vector<1x128xf32> to vector<16x128xf32>
    %71 = arith.addf %69, %70 : vector<16x128xf32>
    %72 = arith.subf %71, %68 : vector<16x128xf32>
    %73 = tpu.reciprocal %72 {approx = true} : vector<16x128xf32> -> vector<16x128xf32>
    %74 = arith.mulf %68, %73 : vector<16x128xf32>
    %75 = vector.broadcast %15 : vector<16x1xf32> to vector<16x128xf32>
    %76 = vector.broadcast %24 : vector<1x128xf32> to vector<16x128xf32>
    %77 = arith.addf %75, %76 : vector<16x128xf32>
    %78 = arith.subf %77, %56 : vector<16x128xf32>
    %79 = vector.broadcast %16 : vector<16x1xf32> to vector<16x128xf32>
    %80 = vector.broadcast %25 : vector<1x128xf32> to vector<16x128xf32>
    %81 = arith.addf %79, %80 : vector<16x128xf32>
    %82 = arith.subf %81, %63 : vector<16x128xf32>
    %83 = arith.mulf %78, %82 : vector<16x128xf32>
    %84 = arith.subf %83, %72 : vector<16x128xf32>
    %85 = tpu.reciprocal %83 {approx = true} : vector<16x128xf32> -> vector<16x128xf32>
    %86 = arith.mulf %84, %85 : vector<16x128xf32>
    %87 = arith.subf %86, %74 : vector<16x128xf32>
    %cst_33 = arith.constant 2.000000e+00 : f32
    %88 = vector.broadcast %cst_33 : f32 to vector<16x128xf32>
    %89 = arith.mulf %88, %87 : vector<16x128xf32>
    %cst_34 = arith.constant 5.000000e+00 : f32
    %90 = vector.broadcast %cst_34 : f32 to vector<16x128xf32>
    %91 = arith.mulf %90, %49 : vector<16x128xf32>
    %92 = arith.addf %91, %12 : vector<16x128xf32>
    %93 = arith.addf %92, %89 : vector<16x128xf32>
    %c0_35 = arith.constant 0 : index
    %c0_36 = arith.constant 0 : index
    %94 = vector.load %arg5[%c0_35, %c0_36] : memref<16x128xf32, #tpu.memory_space<vmem>>, vector<16x128xf32>
    tpu.vector_store %arg5[%c0_35, %c0_36], %93 {strides = array<i32>} : memref<16x128xf32, #tpu.memory_space<vmem>>, vector<16x128xf32>,
    return
  }
  func.func @transform_0(%arg0: i32) -> (i32, i32) {
    %c0_i32 = arith.constant 0 : i32
    %c0_i32_0 = arith.constant 0 : i32
    return %arg0, %c0_i32 : i32, i32
  }
  func.func @transform_1(%arg0: i32) -> (i32, i32) {
    %c0_i32 = arith.constant 0 : i32
    %c0_i32_0 = arith.constant 0 : i32
    return %arg0, %c0_i32 : i32, i32
  }
  func.func @transform_2(%arg0: i32) -> (i32, i32) {
    %c0_i32 = arith.constant 0 : i32
    %c0_i32_0 = arith.constant 0 : i32
    %c0_i32_1 = arith.constant 0 : i32
    return %c0_i32, %c0_i32_0 : i32, i32
  }
  func.func @transform_3(%arg0: i32) -> (i32, i32) {
    %c0_i32 = arith.constant 0 : i32
    %c0_i32_0 = arith.constant 0 : i32
    %c0_i32_1 = arith.constant 0 : i32
    return %c0_i32, %c0_i32_0 : i32, i32
  }
  func.func @transform_4(%arg0: i32) -> (i32, i32) {
    %c0_i32 = arith.constant 0 : i32
    %c0_i32_0 = arith.constant 0 : i32
    return %arg0, %c0_i32 : i32, i32
  }
}

</mosaic_0001>

<bundles_post_ra>
// kernel: tpu_custom_call.1
= control target key start
LH: loop header
LB: loop body
LE: loop exit
PB: predicated region body
PF: predicated region fallthrough
CT: control target
= control target key end

     0   :  { %9 = vsyncpa [#allocation3], 0  ;;  %s715_s0 = inlined_call_operand.hbm [shape: f32[16,32], index: 0, kind: input, shape index: {}]   ;;  %s716_s1 = inlined_call_operand.hbm [shape: f32[16,9], index: 1, kind: input, shape index: {}]   ;;  %s717_s2 = inlined_call_operand.hbm [shape: f32[32,128], index: 2, kind: input, shape index: {}]   ;;  %s718_s3 = inlined_call_operand.vmem [shape: f32[8,128], index: 3, kind: input, shape index: {}]   ;;  %s719_s4 = inlined_call_operand.hbm [shape: f32[16,128], index: 4, kind: output, shape index: {}]  }
   0x1   :  { %10 = vsyncpa [#allocation6], 0 }
   0x2   :  { %11 = vsyncpa [#allocation4], 0  ;;  %s553_s15 = smov [#allocation5]   ;;  %s554_s17 = smov [#allocation2]  }
   0x3   :  { %s29_s16 = sshll.u32 %s553_s15, 4  ;;  %s17_s18 = sshll.u32 %s554_s17, 4  ;;  %s30_s16 = int_to_ptr.vmem [resolvable:$true] %s29_s16  ;;  %s593_s18 = int_to_ptr.vmem [resolvable:$true] %s17_s18 }
   0x4   :  { %s459_s21 = scalar_lea.hbm %s716_s1, 256 }
   0x5   :  { %p460_p0 = scmp.ne.s32.totalorder %s716_s1, %s459_s21  ;;  %p463_p1 = scmp.lt.u32.totalorder %s459_s21, %s716_s1 }
   0x7   :  { %p465_p2 = pnand %p463_p1, %p460_p0 }
   0x9   :  { %468 = shalt.err (!%p465_p2)
}
   0xa   :  { %s469_s26 = scalar_lea.vmem %s30_s16, 256  ;;  %p474_p4 = scmp.lt.s32.totalorder %s30_s16, %s30_s16 }
   0xb   :  { %p470_p3 = scmp.ne.s32.totalorder %s30_s16, %s469_s26  ;;  %p475_p5 = scmp.lt.s32.totalorder %s469_s26, %s469_s26 }
   0xd   :  { %p476_p6 = por %p475_p5, %p474_p4 }
   0xf   :  { %p477_p7 = pnand %p476_p6, %p470_p3 }
  0x11   :  { %480 = shalt.err (!%p477_p7)
}
  0x12   :  { %s555_s27 = smov 128   ;;  %s556_s28 = smov 8  }
  0x13   :  { %35 = dma.hbm_to_vmem [thread:$0]  %s716_s1, 256, %s30_s16, [#allocation6], %s555_s27, %s555_s27, %s556_s28  }
  0x14   :  { %s481_s7 = scalar_lea.hbm %s715_s0, 256 }
  0x15   :  { %p482_p8 = scmp.ne.s32.totalorder %s715_s0, %s481_s7  ;;  %p485_p9 = scmp.lt.u32.totalorder %s481_s7, %s715_s0 }
  0x17   :  { %p487_p10 = pnand %p485_p9, %p482_p8 }
  0x19   :  { %490 = shalt.err (!%p487_p10)
}
  0x1a   :  { %s491_s12 = scalar_lea.vmem %s593_s18, 256  ;;  %p496_p12 = scmp.lt.s32.totalorder %s593_s18, %s593_s18 }
  0x1b   :  { %p492_p11 = scmp.ne.s32.totalorder %s593_s18, %s491_s12  ;;  %p497_p13 = scmp.lt.s32.totalorder %s491_s12, %s491_s12 }
  0x1d   :  { %p498_p0 = por %p497_p13, %p496_p12 }
  0x1f   :  { %p499_p1 = pnand %p498_p0, %p492_p11 }
  0x21   :  { %502 = shalt.err (!%p499_p1)
}
  0x22   :  { %23 = dma.hbm_to_vmem [thread:$0]  %s715_s0, 256, %s593_s18, [#allocation3], %s555_s27, %s555_s27, %s556_s28  }
  0x23   :  { %s557_s14 = smov [#allocation7]   ;;  %s503_s19 = scalar_lea.hbm %s717_s2, 512 }
  0x24   :  { %s41_s15 = sshll.u32 %s557_s14, 4  ;;  %p504_p2 = scmp.ne.s32.totalorder %s717_s2, %s503_s19  ;;  %s42_s15 = int_to_ptr.vmem [resolvable:$true] %s41_s15 }
  0x25   :  { %p507_p3 = scmp.lt.u32.totalorder %s503_s19, %s717_s2 }
  0x27   :  { %p509_p4 = pnand %p507_p3, %p504_p2 }
  0x29   :  { %512 = shalt.err (!%p509_p4)
}
  0x2a   :  { %s513_s24 = scalar_lea.vmem %s42_s15, 512  ;;  %p518_p6 = scmp.lt.s32.totalorder %s42_s15, %s42_s15 }
  0x2b   :  { %p514_p5 = scmp.ne.s32.totalorder %s42_s15, %s513_s24  ;;  %p519_p7 = scmp.lt.s32.totalorder %s513_s24, %s513_s24 }
  0x2d   :  { %p520_p8 = por %p519_p7, %p518_p6 }
  0x2f   :  { %p521_p9 = pnand %p520_p8, %p514_p5 }
  0x31   :  { %524 = shalt.err (!%p521_p9)
}
  0x32   :  { %47 = dma.hbm_to_vmem [thread:$0]  %s717_s2, 512, %s42_s15, [#allocation6], %s555_s27, %s555_s27, %s556_s28  }
  0x33   :  { %547 = dma.done.wait [#allocation3], 256  }
  0x34   :  { %548 = vsyncadd [#allocation3], 4294967040 }
  0x35   :  { %549 = dma.done.wait [#allocation6], 768  }
  0x36   :  { %550 = vsyncadd [#allocation6], 4294966528  ;;  %v558_v0 = vmov 6   ;;  %v559_v1 = vmov 4   ;;  %vm61_vm0 = vcmask 261120   ;;  %v59_v2 = vld [vmem:[#allocation2] sm:$0xff]  ;;  %v224_v43 = vlaneseq }
  0x37   :  { %432 = vset.pattern.permute.xlu1 %v558_v0  ;;  %433 = vset.pattern.permute.xlu0 %v559_v1  ;;  %v60_v3 = vld [vmem:[#allocation2 + $0x8] sm:$0xff]  ;;  %v169_v4 = vld [vmem:[#allocation5] sm:$0xff]  ;;  %v62_v5 = vsel %vm61_vm0, %v59_v2, -inf  ;;  %v170_v6 = vld [vmem:[#allocation5 + $0x8] sm:$0xff]  ;;  %v560_v8 = vmov 7   ;;  %v561_v9 = vmov 5  }
  0x38   :  { %253 = vperm.xlu1 %432, %v169_v4   ;;  %63 = vmax.xlane.f32.xlu0 %v62_v5  ;;  %v65_v7 = vsel %vm61_vm0, %v60_v3, -inf  ;;  %v80_v10 = vld [vmem:[#allocation7] sm:$0xff]  ;;  %v81_v11 = vld [vmem:[#allocation7 + $0x8] sm:$0xff]  ;;  %v82_v12 = vld [vmem:[#allocation7 + $0x10] sm:$0xff]  ;;  %v562_v16 = vmov 2   ;;  %v563_v17 = vmov 8  }
  0x39   :  { %v409_v13 = vpack.c.bf16 %v81_v11, %v80_v10  ;;  %v83_v14 = vld [vmem:[#allocation7 + $0x18] sm:$0xff]  ;;  %v564_v18 = vmov 3   ;;  %v565_v19 = vmov 0   ;;  %v566_v30 = vmov 1   ;;  %v388_v46 = vld [vmem:[%s718_s3 + $0x6] ss:$0 sm:$0xff] }
  0x3a   :  { %v413_v15 = vpack.c.bf16 %v83_v14, %v82_v12  ;;  %v225_v45 = vshrl.u32 %v224_v43, 7  ;;  %v389_v47 = vld [vmem:[%s718_s3 + $0x4] ss:$0 sm:$0xff]  ;;  %v390_v48 = vld [vmem:[%s718_s3 + $0x7] ss:$0 sm:$0xff] }
  0x3b   :  { %410 = vmatprep.subr.bf16.mxu0 %v409_v13  ;;  %v391_v49 = vld [vmem:[%s718_s3 + $0x5] ss:$0 sm:$0xff]  ;;  %v173_v53 = vld [vmem:[%s718_s3 + $0x2] sm:$0x1]  ;;  %v174_v54 = vld [vmem:[%s718_s3 + $0x3] sm:$0x1] }
  0x3c   :  { %257 = vperm.xlu1 %432, %v170_v6   ;;  %66 = vmax.xlane.f32.xlu0 %v65_v7  ;;  %v226_v52 = vsub.s32 0, %v225_v45 }
  0x3d   :  { %412 = vmatpush3.bf16.msra.mxu0 %v409_v13 }
  0x3e   :  { %414 = vmatprep.subr.bf16.mxu0 %v413_v15  ;;  %v227_v63 = vrot.slane %v173_v53, %v226_v52  ;;  %v679_v0 = vrot.slane %v174_v54, %v226_v52 }
  0x40   :  { %434 = vset.pattern.permute.xlu1 %v559_v1 }
  0x41   :  { %271 = vperm.xlu1 %434, %v170_v6   ;;  %416 = vmatpush3.bf16.msra.mxu0 %v413_v15 }
  0x45   :  { %435 = vset.pattern.permute.xlu1 %v560_v8 }
  0x46   :  { %283 = vperm.xlu1 %435, %v169_v4  }
  0x4a   :  { %287 = vperm.xlu1 %435, %v170_v6  }
  0x4e   :  { %436 = vset.pattern.permute.xlu1 %v561_v9 }
  0x4f   :  { %297 = vperm.xlu1 %436, %v169_v4  }
  0x52   :  { %267 = vperm.xlu0 %433, %v169_v4  }
  0x53   :  { %301 = vperm.xlu1 %436, %v170_v6  }
  0x56   :  { %440 = vset.pattern.permute.xlu0 %v563_v17 }
  0x57   :  { %437 = vset.pattern.permute.xlu1 %v562_v16 }
  0x58   :  { %217 = vperm.xlu1 %437, %v169_v4  }
  0x5c   :  { %221 = vperm.xlu1 %437, %v170_v6  }
  0x60   :  { %438 = vset.pattern.permute.xlu1 %v564_v18 }
  0x61   :  { %235 = vperm.xlu1 %438, %v169_v4  }
  0x65   :  { %239 = vperm.xlu1 %438, %v170_v6  }
  0x69   :  { %439 = vset.pattern.permute.xlu1 %v563_v17 }
  0x6a   :  { %319 = vperm.xlu1 %439, %v169_v4  }
  0x6e   :  { %441 = vset.pattern.permute.xlu1 %v565_v19 }
  0xb7   :  { %v254_v31 = vpop.permute.xlu1 %253 }
  0xb8   :  { %v264_v55 = vmin.f32 %v254_v31, %v388_v46  ;;  %v386_v31 = vld [vmem:[%s718_s3] ss:$0 sm:$0xff] }
  0xbb   :  { %v258_v32 = vpop.permute.xlu1 %257 }
  0xbc   :  { %v265_v59 = vmin.f32 %v258_v32, %v388_v46  ;;  %v387_v32 = vld [vmem:[%s718_s3 + $0x1] ss:$0 sm:$0xff]  ;;  %s567_s3 = smov [#allocation8]  }
  0xbd   :  { %s371_s15 = sshll.u32 %s567_s3, 4  ;;  %s372_s15 = int_to_ptr.vmem [resolvable:$true] %s371_s15 }
  0xbe   :  { %s525_s16 = scalar_lea.vmem %s372_s15, 256  ;;  %p530_p11 = scmp.lt.s32.totalorder %s372_s15, %s372_s15 }
  0xbf   :  { %p526_p10 = scmp.ne.s32.totalorder %s372_s15, %s525_s16  ;;  %p531_p12 = scmp.lt.s32.totalorder %s525_s16, %s525_s16 }
  0xc0   :  { %v272_v33 = vpop.permute.xlu1 %271 }
  0xc1   :  { %v279_v60 = vmax.f32 %v272_v33, %v389_v47  ;;  %p532_p13 = por %p531_p12, %p530_p11 }
  0xc3   :  { %p533_p0 = pnand %p532_p13, %p526_p10 }
  0xc5   :  { %v64_v20 = vpop.xlane.xlu0 %63  ;;  %v284_v34 = vpop.permute.xlu1 %283 }
  0xc6   :  { %v68_v21 = vsub.f32 %v59_v2, %v64_v20  ;;  %v294_v56 = vmin.f32 %v284_v34, %v390_v48 }
  0xc8   :  { %v70_v22 = vmul.f32 1.442695, %v68_v21 }
  0xc9   :  { %v67_v23 = vpop.xlane.xlu0 %66  ;;  %v288_v35 = vpop.permute.xlu1 %287 }
  0xca   :  { %443 = vpow2.f32 %v70_v22  ;;  %v69_v24 = vsub.f32 %v60_v3, %v67_v23  ;;  %v295_v61 = vmin.f32 %v288_v35, %v390_v48 }
  0xcc   :  { %v72_v25 = vmul.f32 1.442695, %v69_v24 }
  0xce   :  { %445 = vpow2.f32 %v72_v25  ;;  %v298_v36 = vpop.permute.xlu1 %297 }
  0xcf   :  { %v308_v57 = vmax.f32 %v298_v36, %v391_v49 }
  0xd1   :  { %v268_v50 = vpop.permute.xlu0 %267  ;;  %v310_v2 = vsub.f32 %v294_v56, %v308_v57 }
  0xd2   :  { %v302_v37 = vpop.permute.xlu1 %301  ;;  %v278_v58 = vmax.f32 %v268_v50, %v389_v47 }
  0xd3   :  { %v309_v62 = vmax.f32 %v302_v37, %v391_v49  ;;  %v314_v10 = vmax.f32 %v310_v2, 0.0 }
  0xd4   :  { %v444_v26 = vpop.eup %443  ;;  %v280_v3 = vsub.f32 %v264_v55, %v278_v58 }
  0xd5   :  { %406 = vmatprep.mubr.msk.f32.mxu0 %vm61_vm0, %v444_v26  ;;  %v74_v27 = vsel %vm61_vm0, %v444_v26, 0.0  ;;  %v311_v7 = vsub.f32 %v295_v61, %v309_v62 }
  0xd6   :  { %75 = vadd.xlane.f32.xlu1 %v74_v27  ;;  %v312_v11 = vmax.f32 %v280_v3, 0.0 }
  0xd7   :  { %v651_v38 = vpop.permute.xlu1 %217  ;;  %v315_v15 = vmax.f32 %v311_v7, 0.0 }
  0xd8   :  { %v446_v28 = vpop.eup %445  ;;  %v338_v8 = vadd.f32 %v227_v63, %v651_v38  ;;  %v316_v22 = vmul.f32 %v314_v10, %v312_v11  ;;  %v228_v48 = vsub.f32 %v651_v38, %v227_v63 }
  0xd9   :  { %407 = vmatmul.mubr.msk.f32.vlgmr.msra.gmra.mrb[0].mxu0 %vm61_vm0, %v446_v28  ;;  %v77_v29 = vsel %vm61_vm0, %v446_v28, 0.0 }
  0xda   :  { %78 = vadd.xlane.f32.xlu0 %v77_v29  ;;  %v340_v18 = vsub.f32 %v338_v8, %v280_v3  ;;  %v230_v55 = vand.u32 2147483647, %v228_v48 }
  0xdb   :  { %v653_v39 = vpop.permute.xlu1 %221 }
  0xdc   :  { %v339_v19 = vadd.f32 %v227_v63, %v653_v39  ;;  %v229_v47 = vsub.f32 %v653_v39, %v227_v63 }
  0xe0   :  { %v655_v40 = vpop.permute.xlu1 %235 }
  0xe1   :  { %v342_v9 = vadd.f32 %v679_v0, %v655_v40  ;;  %v246_v56 = vsub.f32 %v655_v40, %v679_v0 }
  0xe3   :  { %v344_v17 = vsub.f32 %v342_v9, %v310_v2  ;;  %v248_v63 = vand.u32 2147483647, %v246_v56 }
  0xe4   :  { %v657_v41 = vpop.permute.xlu1 %239 }
  0xe5   :  { %v343_v20 = vadd.f32 %v679_v0, %v657_v41  ;;  %v346_v25 = vmul.f32 %v344_v17, %v340_v18 }
  0xe7   :  { %182 = vperm.xlu1 %441, %v169_v4   ;;  %v345_v27 = vsub.f32 %v343_v20, %v311_v7  ;;  %447 = vrcp.f32 %v346_v25 }
  0xe9   :  { %v320_v42 = vpop.permute.xlu1 %319 }
  0xeb   :  { %187 = vperm.xlu1 %441, %v170_v6  }
  0xef   :  { %442 = vset.pattern.permute.xlu1 %v566_v30 }
  0xf0   :  { %199 = vperm.xlu1 %442, %v169_v4   ;;  %323 = vperm.xlu0 %440, %v170_v6   ;;  %v179_v4 = vmul.f32 %v174_v54, %v173_v53  ;;  %v231_v53 = vand.u32 2147483647, %v229_v47 }
  0xf2   :  { %v329_v12 = vrot.slane %v179_v4, %v226_v52  ;;  %v448_v52 = vpop.eup %447 }
  0xf4   :  { %203 = vperm.xlu1 %442, %v170_v6   ;;  %v281_v6 = vsub.f32 %v265_v59, %v279_v60  ;;  %v330_v23 = vadd.f32 %v329_v12, %v320_v42 }
  0xf6   :  { %v313_v14 = vmax.f32 %v281_v6, 0.0  ;;  %v341_v26 = vsub.f32 %v339_v19, %v281_v6  ;;  %v332_v30 = vsub.f32 %v330_v23, %v316_v22 }
  0xf8   :  { %v317_v24 = vmul.f32 %v315_v15, %v313_v14  ;;  %v347_v35 = vmul.f32 %v345_v27, %v341_v26  ;;  %v348_v57 = vsub.f32 %v346_v25, %v332_v30 }
  0xfa   :  { %v352_v2 = vmul.f32 %v448_v52, %v348_v57 }
 0x163   :  { %v659_v44 = vpop.xlane.xlu1 %75 }
 0x167   :  { %v183_v51 = vpop.permute.xlu1 %182  ;;  %v79_v5 = vpop.xlane.xlu0 %78 }
 0x168   :  { %v194_v36 = vsub.f32 %v183_v51, %v386_v31  ;;  %v247_v51 = vsub.f32 %v657_v41, %v679_v0 }
 0x16a   :  { %v196_v45 = vand.u32 2147483647, %v194_v36  ;;  %v249_v60 = vand.u32 2147483647, %v247_v51 }
 0x16b   :  { %v188_v1 = vpop.permute.xlu1 %187 }
 0x16c   :  { %v195_v33 = vsub.f32 %v188_v1, %v386_v31 }
 0x16e   :  { %v197_v42 = vand.u32 2147483647, %v195_v33 }
 0x16f   :  { %v324_v13 = vpop.permute.xlu0 %323  ;;  %v200_v16 = vpop.permute.xlu1 %199 }
 0x170   :  { %v331_v21 = vadd.f32 %v329_v12, %v324_v13  ;;  %v210_v37 = vsub.f32 %v200_v16, %v387_v32 }
 0x172   :  { %v333_v28 = vsub.f32 %v331_v21, %v317_v24  ;;  %v212_v46 = vand.u32 2147483647, %v210_v37 }
 0x173   :  { %v204_v29 = vpop.permute.xlu1 %203 }
 0x174   :  { %v211_v34 = vsub.f32 %v204_v29, %v387_v32  ;;  %449 = vrcp.f32 %v333_v28  ;;  %v214_v50 = vadd.f32 %v212_v46, %v196_v45  ;;  %v349_v39 = vsub.f32 %v347_v35, %v333_v28 }
 0x175   :  { %451 = vrcp.f32 %v332_v30 }
 0x176   :  { %v213_v43 = vand.u32 2147483647, %v211_v34  ;;  %453 = vrcp.f32 %v347_v35  ;;  %v232_v38 = vadd.f32 %v230_v55, %v214_v50 }
 0x177   :  { %455 = vrcp.f32 %v79_v5 }
 0x178   :  { %v215_v49 = vadd.f32 %v213_v43, %v197_v42  ;;  %457 = vrcp.f32 %v659_v44  ;;  %v250_v4 = vadd.f32 %v248_v63, %v232_v38 }
 0x17a   :  { %v233_v59 = vadd.f32 %v231_v53, %v215_v49  ;;  %v358_v11 = vmul.f32 5.0, %v250_v4 }
 0x17c   :  { %v251_v41 = vadd.f32 %v249_v60, %v233_v59 }
 0x17e   :  { %v450_v54 = vpop.eup %449  ;;  %v359_v0 = vmul.f32 5.0, %v251_v41 }
 0x17f   :  { %v452_v58 = vpop.eup %451  ;;  %v337_v61 = vmul.f32 %v450_v54, %v317_v24 }
 0x180   :  { %v454_v62 = vpop.eup %453  ;;  %v336_v1 = vmul.f32 %v452_v58, %v316_v22 }
 0x181   :  { %v353_v3 = vmul.f32 %v454_v62, %v349_v39  ;;  %v456_v5 = vpop.eup %455 }
 0x182   :  { %v354_v7 = vsub.f32 %v352_v2, %v336_v1  ;;  %v458_v8 = vpop.eup %457 }
 0x183   :  { %v355_v44 = vsub.f32 %v353_v3, %v337_v61 }
 0x184   :  { %v356_v14 = vmul.f32 2.0, %v354_v7 }
 0x185   :  { %v357_v12 = vmul.f32 2.0, %v355_v44 }
 0x1ac   :  { %v408_v6 = vpop.f32.mrb[0].mxu0 }
 0x1ad   :  { %v168_v40 = vmul.f32 %v456_v5, %v408_v6  ;;  %v156_v9 = vpop.f32.mrb[1].mxu0 }
 0x1ae   :  { %v167_v10 = vmul.f32 %v458_v8, %v156_v9 }
 0x1af   :  { %v361_v13 = vadd.f32 %v359_v0, %v168_v40 }
 0x1b0   :  { %v360_v15 = vadd.f32 %v358_v11, %v167_v10 }
 0x1b1   :  { %v363_v16 = vadd.f32 %v361_v13, %v357_v12 }
 0x1b2   :  { %v362_v17 = vadd.f32 %v360_v15, %v356_v14 }
 0x1b3   :  { %365 = vst [vmem:[#allocation8 + $0x8] sm:$0xff] %v363_v16 }
 0x1b4   :  { %364 = vst [vmem:[#allocation8] sm:$0xff] %v362_v17 }
 0x1b5   :  { %536 = shalt.err (!%p533_p0)
}
 0x1b6   :  { %s537_s20 = scalar_lea.hbm %s719_s4, 256 }
 0x1b7   :  { %p538_p1 = scmp.ne.s32.totalorder %s719_s4, %s537_s20  ;;  %p541_p2 = scmp.lt.u32.totalorder %s537_s20, %s719_s4 }
 0x1b9   :  { %p543_p3 = pnand %p541_p2, %p538_p1 }
 0x1bb   :  { %546 = shalt.err (!%p543_p3)
}
 0x1bc   :  { %377 = dma.vmem_to_hbm [thread:$0]  %s372_s15, 256, %s719_s4, [#allocation4], %s555_s27, %s555_s27, %s556_s28  }
 0x1bd   :  { %551 = dma.done.wait [#allocation4], 256  }
 0x1be   :  { %552 = vsyncadd [#allocation4], 4294967040 }
 0x1bf   :  { %381 = vsyncpa [#allocation3], 1 }
 0x1c0   :  { %382 = vsyncpa [#allocation6], 1 }
 0x1c1   :  { %383 = vsyncpa [#allocation4], 1 }

</bundles_post_ra>
